<compile_context>
chip_gen: v6e
topology: v6e:2x2x1
jax: 0.10.0
libtpu: 0.0.40
codegen_flags: <defaults>
</compile_context>

<pallas_src>
import jax
import jax.numpy as jnp
from jax.experimental import pallas as pl
from jax.experimental.pallas import tpu as pltpu

BN_EPS = 1e-5
LANE = 128          # TPU lane width; weights/activations padded to this
OUT_LANES = 8       # trimmed output width (cols 0/1 = sbp/dbp)
H1, H2 = 35, 20     # hidden widths from the torch module


def _pad_dim(n):
    # multiple of 16 so bf16 sublane slices of the weight slab stay aligned
    return ((n + 15) // 16) * 16


def _hardsigmoid(x):
    # torch.nn.Hardsigmoid: clip(x/6 + 0.5, 0, 1); mul, not div.
    return jnp.clip(x * (1.0 / 6.0) + 0.5, 0.0, 1.0)


def _batchnorm_folded(x, gamma, beta):
    """Training-mode BN, one-pass stats, folded affine: y = x*scale + shift."""
    mean = jnp.mean(x, axis=0, keepdims=True)
    var = jnp.mean(x * x, axis=0, keepdims=True) - mean * mean
    scale = gamma * jax.lax.rsqrt(var + BN_EPS)      # EUP rsqrt (free slot)
    return x * scale + (beta - mean * scale)          # 2 broadcast VPU ops


def _make_kernel(fp):
    """fp = feature dim padded to a multiple of 16 (static)."""

    def kernel(x_ref, wslab_ref, vslab_ref, out_ref):
        x = x_ref[...]                                # (B, fp) f32
        vec = vslab_ref[...]                          # (8, 128) f32 packed vectors
        b1, g1, be1 = vec[0:1], vec[1:2], vec[2:3]
        b2, g2, be2 = vec[3:4], vec[4:5], vec[5:6]
        bh = vec[6:7]                                 # fused head bias (cols 0,1)

        # Linear(F,35) -> Hardsigmoid -> BN(35)   (bf16 MXU, f32 accumulate)
        w1 = wslab_ref[0:fp, :]                       # (fp, 128) bf16
        h = jnp.dot(x.astype(jnp.bfloat16), w1,
                    preferred_element_type=jnp.float32) + b1
        h = _batchnorm_folded(_hardsigmoid(h), g1, be1)

        # Linear(35,20) -> Hardsigmoid -> BN(20)
        w2 = wslab_ref[fp:fp + LANE, :]               # (128, 128) bf16
        h = jnp.dot(h.astype(jnp.bfloat16), w2,
                    preferred_element_type=jnp.float32) + b2
        h = _batchnorm_folded(_hardsigmoid(h), g2, be2)

        # Fused heads: one lane-dense MXU pass; store only the first 8 lanes.
        wh = wslab_ref[fp + LANE:fp + 2 * LANE, :]    # (128, 128) bf16
        res = jnp.dot(h.astype(jnp.bfloat16), wh,
                      preferred_element_type=jnp.float32) + bh   # (B, 128) f32
        out_ref[...] = res[:, :OUT_LANES]             # (B, 8)

    return kernel


def pack_params(params, n_features):
    """Pack 12 torch-style tensors into (bf16 weight slab, f32 vector slab)."""
    w1, b1, g1, be1, w2, b2, g2, be2, ws, bs, wd, bd = params
    fp = _pad_dim(n_features)

    w1p = jnp.zeros((fp, LANE), jnp.float32).at[:n_features, :H1].set(w1)
    w2p = jnp.zeros((LANE, LANE), jnp.float32).at[:H1, :H2].set(w2)
    whp = (jnp.zeros((LANE, LANE), jnp.float32)
           .at[:H2, 0:1].set(ws)
           .at[:H2, 1:2].set(wd))
    wslab = jnp.concatenate([w1p, w2p, whp], axis=0).astype(jnp.bfloat16)

    vslab = jnp.zeros((8, LANE), jnp.float32)
    vslab = (vslab
             .at[0, :H1].set(b1[0]).at[1, :H1].set(g1[0]).at[2, :H1].set(be1[0])
             .at[3, :H2].set(b2[0]).at[4, :H2].set(g2[0]).at[5, :H2].set(be2[0])
             .at[6, 0].set(bs[0, 0]).at[6, 1].set(bd[0, 0]))
    return wslab, vslab


def pad_features(x, n_features):
    """Pad features once, outside the per-call forward (no per-call HBM copy)."""
    fp = _pad_dim(n_features)
    if x.shape[1] == fp:
        return x
    return jnp.pad(x, ((0, 0), (0, fp - x.shape[1])))


@jax.jit
def mlp_forward(x, wslab, vslab):
    B = x.shape[0]
    fp = wslab.shape[0] - 2 * LANE
    assert x.shape[1] == fp, "call pad_features() once before mlp_forward()"

    vmem = pl.BlockSpec(memory_space=pltpu.MemorySpace.VMEM)

    flops = 2 * B * (fp * LANE + LANE * LANE + LANE * LANE)
    bytes_accessed = (x.size * x.dtype.itemsize
                      + wslab.size * wslab.dtype.itemsize
                      + vslab.size * vslab.dtype.itemsize
                      + B * OUT_LANES * 4)

    # Rough gridless working set: x + 2 activation slabs + head result + params.
    vmem_need = (4 * B * (fp + 3 * LANE)
                 + wslab.size * wslab.dtype.itemsize
                 + vslab.size * 4)
    compiler_params = None
    if vmem_need > (24 << 20):     # beyond the default scoped limit -> raise it
        compiler_params = pltpu.CompilerParams(
            vmem_limit_bytes=min(2 * int(vmem_need), 64 << 20))

    out = pl.pallas_call(
        _make_kernel(fp),
        out_shape=jax.ShapeDtypeStruct((B, OUT_LANES), jnp.float32),
        in_specs=[vmem, vmem, vmem],
        out_specs=vmem,
        compiler_params=compiler_params,
        cost_estimate=pl.CostEstimate(flops=flops,
                                      transcendentals=2 * LANE,
                                      bytes_accessed=bytes_accessed),
    )(x, wslab, vslab)
    return out[:, 0:1], out[:, 1:2]


def init_params(key, n_features):
    """Deterministic init mimicking torch.nn.Linear default U(-1/sqrt(fan_in),+)."""
    def linear(key, fan_in, fan_out):
        kw, kb = jax.random.split(key)
        bound = 1.0 / jnp.sqrt(fan_in)
        w = jax.random.uniform(kw, (fan_in, fan_out), jnp.float32, -bound, bound)
        b = jax.random.uniform(kb, (1, fan_out), jnp.float32, -bound, bound)
        return w, b

    k1, k2, k3, k4 = jax.random.split(key, 4)
    w1, b1 = linear(k1, n_features, H1)
    g1, be1 = jnp.ones((1, H1), jnp.float32), jnp.zeros((1, H1), jnp.float32)
    w2, b2 = linear(k2, H1, H2)
    g2, be2 = jnp.ones((1, H2), jnp.float32), jnp.zeros((1, H2), jnp.float32)
    ws, bs = linear(k3, H2, 1)
    wd, bd = linear(k4, H2, 1)
    return (w1, b1, g1, be1, w2, b2, g2, be2, ws, bs, wd, bd)


def reference_forward_f32(x, params):
    """Pure-JAX torch-faithful f32 reference (training-mode BN)."""
    w1, b1, g1, be1, w2, b2, g2, be2, ws, bs, wd, bd = params

    def bn(x, gamma, beta):
        mean = jnp.mean(x, axis=0, keepdims=True)
        var = jnp.mean((x - mean) ** 2, axis=0, keepdims=True)
        return (x - mean) * jax.lax.rsqrt(var + BN_EPS) * gamma + beta

    h1 = bn(_hardsigmoid(x @ w1 + b1), g1, be1)
    h2 = bn(_hardsigmoid(h1 @ w2 + b2), g2, be2)
    return h2 @ ws + bs, h2 @ wd + bd


def reference_forward_bf16(x, params):
    """Same math with the kernel's precision choices (bf16 dots, f32 accum/BN)."""
    w1, b1, g1, be1, w2, b2, g2, be2, ws, bs, wd, bd = params

    def mm(a, w):
        return jnp.dot(a.astype(jnp.bfloat16), w.astype(jnp.bfloat16),
                       preferred_element_type=jnp.float32)

    h1 = _batchnorm_folded(_hardsigmoid(mm(x, w1) + b1), g1, be1)
    h2 = _batchnorm_folded(_hardsigmoid(mm(h1, w2) + b2), g2, be2)
    return mm(h2, ws) + bs, mm(h2, wd) + bd


if __name__ == "__main__":
    B, F = 8, 32
    key = jax.random.PRNGKey(0)
    kx, kp = jax.random.split(key)
    x = jax.random.normal(kx, (B, F), jnp.float32)
    params = init_params(kp, F)
    wslab, vslab = pack_params(params, F)
    x_padded = pad_features(x, F)           # hoisted out of the per-call path

    sbp, dbp = mlp_forward(x_padded, wslab, vslab)
    jax.block_until_ready((sbp, dbp))
    assert sbp.shape == (B, 1) and dbp.shape == (B, 1)

    # Tight check vs a precision-matched reference (validates the kernel).
    sbp_m, dbp_m = reference_forward_bf16(x, params)
    err_m = float(jnp.max(jnp.abs(jnp.concatenate(
        [sbp - sbp_m, dbp - dbp_m], axis=1))))
    assert err_m < 2e-3, err_m

    # Loose check vs the full-f32 torch-faithful reference (bf16-MXU budget).
    sbp_f, dbp_f = reference_forward_f32(x, params)
    err_f = float(jnp.max(jnp.abs(jnp.concatenate(
        [sbp - sbp_f, dbp - dbp_f], axis=1))))
    assert err_f < 0.12, err_f

    print(f"max |kernel - bf16_ref| = {err_m:.3e}, "
          f"max |kernel - f32_ref| = {err_f:.3e}")
    print("KERNEL_OK")
</pallas_src>

<mosaic_0001>
module attributes {stable_mosaic.version = 11 : i64} {
  func.func @kernel(%arg0: memref<8x32xf32, #tpu.memory_space<vmem>>, %arg1: memref<288x128xbf16, #tpu.memory_space<vmem>>, %arg2: memref<8x128xf32, #tpu.memory_space<vmem>>, %arg3: memref<8x8xf32, #tpu.memory_space<vmem>>) attributes {dimension_semantics = [], scalar_prefetch = 0 : i64, scratch_operands = 0 : i64, tpu.core_type = #tpu.core_type<tc>} {
    %c0 = arith.constant 0 : index
    %c0_0 = arith.constant 0 : index
    %0 = vector.load %arg0[%c0, %c0_0] : memref<8x32xf32, #tpu.memory_space<vmem>>, vector<8x32xf32>
    %c0_1 = arith.constant 0 : index
    %c0_2 = arith.constant 0 : index
    %1 = vector.load %arg2[%c0_1, %c0_2] : memref<8x128xf32, #tpu.memory_space<vmem>>, vector<8x128xf32>
    %2 = vector.extract_strided_slice %1 {offsets = [0, 0], sizes = [1, 128], strides = [1, 1]} : vector<8x128xf32> to vector<1x128xf32>
    %3 = vector.extract_strided_slice %1 {offsets = [1, 0], sizes = [1, 128], strides = [1, 1]} : vector<8x128xf32> to vector<1x128xf32>
    %4 = vector.extract_strided_slice %1 {offsets = [2, 0], sizes = [1, 128], strides = [1, 1]} : vector<8x128xf32> to vector<1x128xf32>
    %5 = vector.extract_strided_slice %1 {offsets = [3, 0], sizes = [1, 128], strides = [1, 1]} : vector<8x128xf32> to vector<1x128xf32>
    %6 = vector.extract_strided_slice %1 {offsets = [4, 0], sizes = [1, 128], strides = [1, 1]} : vector<8x128xf32> to vector<1x128xf32>
    %7 = vector.extract_strided_slice %1 {offsets = [5, 0], sizes = [1, 128], strides = [1, 1]} : vector<8x128xf32> to vector<1x128xf32>
    %8 = vector.extract_strided_slice %1 {offsets = [6, 0], sizes = [1, 128], strides = [1, 1]} : vector<8x128xf32> to vector<1x128xf32>
    %c0_3 = arith.constant 0 : index
    %c0_4 = arith.constant 0 : index
    %9 = vector.load %arg1[%c0_3, %c0_4] : memref<288x128xbf16, #tpu.memory_space<vmem>>, vector<32x128xbf16>
    %10 = arith.truncf %0 : vector<8x32xf32> to vector<8x32xbf16>
    %cst = arith.constant dense<0.000000e+00> : vector<8x128xf32>
    %11 = tpu.matmul %10, %9, %cst {dimension_numbers = #tpu.dot_dimension_numbers<[1], [0], [0], [1], [0, 0, 1, 1], [], []>} : vector<8x32xbf16>, vector<32x128xbf16>, vector<8x128xf32> -> vector<8x128xf32>
    %12 = vector.broadcast %2 : vector<1x128xf32> to vector<8x128xf32>
    %13 = arith.addf %11, %12 : vector<8x128xf32>
    %cst_5 = arith.constant 0.166666672 : f32
    %14 = vector.broadcast %cst_5 : f32 to vector<8x128xf32>
    %15 = arith.mulf %13, %14 : vector<8x128xf32>
    %cst_6 = arith.constant 5.000000e-01 : f32
    %16 = vector.broadcast %cst_6 : f32 to vector<8x128xf32>
    %17 = arith.addf %15, %16 : vector<8x128xf32>
    %cst_7 = arith.constant 0.000000e+00 : f32
    %cst_8 = arith.constant 1.000000e+00 : f32
    %18 = vector.broadcast %cst_7 : f32 to vector<8x128xf32>
    %19 = arith.maximumf %18, %17 : vector<8x128xf32>
    %20 = vector.broadcast %cst_8 : f32 to vector<8x128xf32>
    %21 = arith.minimumf %20, %19 : vector<8x128xf32>
    %cst_9 = arith.constant dense<0.000000e+00> : vector<128xf32>
    %22 = vector.multi_reduction <add>, %21, %cst_9 [0] : vector<8x128xf32> to vector<128xf32>
    %23 = vector.shape_cast %22 : vector<128xf32> to vector<1x128xf32>
    %cst_10 = arith.constant 8.000000e+00 : f32
    %24 = vector.broadcast %cst_10 : f32 to vector<1x128xf32>
    %25 = arith.divf %23, %24 : vector<1x128xf32>
    %26 = arith.mulf %21, %21 : vector<8x128xf32>
    %cst_11 = arith.constant dense<0.000000e+00> : vector<128xf32>
    %27 = vector.multi_reduction <add>, %26, %cst_11 [0] : vector<8x128xf32> to vector<128xf32>
    %28 = vector.shape_cast %27 : vector<128xf32> to vector<1x128xf32>
    %cst_12 = arith.constant 8.000000e+00 : f32
    %29 = vector.broadcast %cst_12 : f32 to vector<1x128xf32>
    %30 = arith.divf %28, %29 : vector<1x128xf32>
    %31 = arith.mulf %25, %25 : vector<1x128xf32>
    %32 = arith.subf %30, %31 : vector<1x128xf32>
    %cst_13 = arith.constant 9.99999974E-6 : f32
    %33 = vector.broadcast %cst_13 : f32 to vector<1x128xf32>
    %34 = arith.addf %32, %33 : vector<1x128xf32>
    %35 = math.rsqrt %34 : vector<1x128xf32>
    %36 = arith.mulf %3, %35 : vector<1x128xf32>
    %37 = vector.broadcast %36 : vector<1x128xf32> to vector<8x128xf32>
    %38 = arith.mulf %21, %37 : vector<8x128xf32>
    %39 = arith.mulf %25, %36 : vector<1x128xf32>
    %40 = arith.subf %4, %39 : vector<1x128xf32>
    %41 = vector.broadcast %40 : vector<1x128xf32> to vector<8x128xf32>
    %42 = arith.addf %38, %41 : vector<8x128xf32>
    %c32 = arith.constant 32 : index
    %c0_14 = arith.constant 0 : index
    %43 = vector.load %arg1[%c32, %c0_14] : memref<288x128xbf16, #tpu.memory_space<vmem>>, vector<128x128xbf16>
    %44 = arith.truncf %42 : vector<8x128xf32> to vector<8x128xbf16>
    %cst_15 = arith.constant dense<0.000000e+00> : vector<8x128xf32>
    %45 = tpu.matmul %44, %43, %cst_15 {dimension_numbers = #tpu.dot_dimension_numbers<[1], [0], [0], [1], [0, 0, 1, 1], [], []>} : vector<8x128xbf16>, vector<128x128xbf16>, vector<8x128xf32> -> vector<8x128xf32>
    %46 = vector.broadcast %5 : vector<1x128xf32> to vector<8x128xf32>
    %47 = arith.addf %45, %46 : vector<8x128xf32>
    %cst_16 = arith.constant 0.166666672 : f32
    %48 = vector.broadcast %cst_16 : f32 to vector<8x128xf32>
    %49 = arith.mulf %47, %48 : vector<8x128xf32>
    %cst_17 = arith.constant 5.000000e-01 : f32
    %50 = vector.broadcast %cst_17 : f32 to vector<8x128xf32>
    %51 = arith.addf %49, %50 : vector<8x128xf32>
    %cst_18 = arith.constant 0.000000e+00 : f32
    %cst_19 = arith.constant 1.000000e+00 : f32
    %52 = vector.broadcast %cst_18 : f32 to vector<8x128xf32>
    %53 = arith.maximumf %52, %51 : vector<8x128xf32>
    %54 = vector.broadcast %cst_19 : f32 to vector<8x128xf32>
    %55 = arith.minimumf %54, %53 : vector<8x128xf32>
    %cst_20 = arith.constant dense<0.000000e+00> : vector<128xf32>
    %56 = vector.multi_reduction <add>, %55, %cst_20 [0] : vector<8x128xf32> to vector<128xf32>
    %57 = vector.shape_cast %56 : vector<128xf32> to vector<1x128xf32>
    %cst_21 = arith.constant 8.000000e+00 : f32
    %58 = vector.broadcast %cst_21 : f32 to vector<1x128xf32>
    %59 = arith.divf %57, %58 : vector<1x128xf32>
    %60 = arith.mulf %55, %55 : vector<8x128xf32>
    %cst_22 = arith.constant dense<0.000000e+00> : vector<128xf32>
    %61 = vector.multi_reduction <add>, %60, %cst_22 [0] : vector<8x128xf32> to vector<128xf32>
    %62 = vector.shape_cast %61 : vector<128xf32> to vector<1x128xf32>
    %cst_23 = arith.constant 8.000000e+00 : f32
    %63 = vector.broadcast %cst_23 : f32 to vector<1x128xf32>
    %64 = arith.divf %62, %63 : vector<1x128xf32>
    %65 = arith.mulf %59, %59 : vector<1x128xf32>
    %66 = arith.subf %64, %65 : vector<1x128xf32>
    %cst_24 = arith.constant 9.99999974E-6 : f32
    %67 = vector.broadcast %cst_24 : f32 to vector<1x128xf32>
    %68 = arith.addf %66, %67 : vector<1x128xf32>
    %69 = math.rsqrt %68 : vector<1x128xf32>
    %70 = arith.mulf %6, %69 : vector<1x128xf32>
    %71 = vector.broadcast %70 : vector<1x128xf32> to vector<8x128xf32>
    %72 = arith.mulf %55, %71 : vector<8x128xf32>
    %73 = arith.mulf %59, %70 : vector<1x128xf32>
    %74 = arith.subf %7, %73 : vector<1x128xf32>
    %75 = vector.broadcast %74 : vector<1x128xf32> to vector<8x128xf32>
    %76 = arith.addf %72, %75 : vector<8x128xf32>
    %c160 = arith.constant 160 : index
    %c0_25 = arith.constant 0 : index
    %77 = vector.load %arg1[%c160, %c0_25] : memref<288x128xbf16, #tpu.memory_space<vmem>>, vector<128x128xbf16>
    %78 = arith.truncf %76 : vector<8x128xf32> to vector<8x128xbf16>
    %cst_26 = arith.constant dense<0.000000e+00> : vector<8x128xf32>
    %79 = tpu.matmul %78, %77, %cst_26 {dimension_numbers = #tpu.dot_dimension_numbers<[1], [0], [0], [1], [0, 0, 1, 1], [], []>} : vector<8x128xbf16>, vector<128x128xbf16>, vector<8x128xf32> -> vector<8x128xf32>
    %80 = vector.broadcast %8 : vector<1x128xf32> to vector<8x128xf32>
    %81 = arith.addf %79, %80 : vector<8x128xf32>
    %82 = vector.extract_strided_slice %81 {offsets = [0, 0], sizes = [8, 8], strides = [1, 1]} : vector<8x128xf32> to vector<8x8xf32>
    %c0_27 = arith.constant 0 : index
    %c0_28 = arith.constant 0 : index
    %83 = vector.load %arg3[%c0_27, %c0_28] : memref<8x8xf32, #tpu.memory_space<vmem>>, vector<8x8xf32>
    tpu.vector_store %arg3[%c0_27, %c0_28], %82 {strides = array<i32>} : memref<8x8xf32, #tpu.memory_space<vmem>>, vector<8x8xf32>,
    return
  }
}

</mosaic_0001>

<bundles_post_ra>
// kernel: mlp_forward.1
= control target key start
LH: loop header
LB: loop body
LE: loop exit
PB: predicated region body
PF: predicated region fallthrough
CT: control target
= control target key end

     0   :  { %8 = vsyncpa [#allocation3], 0  ;;  %s683_s0 = inlined_call_operand.hbm [shape: f32[8,32], index: 0, kind: input, shape index: {}]   ;;  %s684_s1 = inlined_call_operand.hbm [shape: bf16[288,128], index: 1, kind: input, shape index: {}]   ;;  %s685_s2 = inlined_call_operand.hbm [shape: f32[8,128], index: 2, kind: input, shape index: {}]   ;;  %s686_s3 = inlined_call_operand.vmem [shape: f32[8,8], index: 3, kind: output, shape index: {}]  }
   0x1   :  { %9 = vsyncpa [#allocation5], 0  ;;  %s605_s12 = smov [#allocation4]  }
   0x2   :  { %s25_s13 = sshll.u32 %s605_s12, 4  ;;  %s26_s13 = int_to_ptr.vmem [resolvable:$true] %s25_s13 }
   0x3   :  { %s549_s14 = scalar_lea.vmem %s26_s13, 2304  ;;  %p554_p1 = scmp.lt.s32.totalorder %s26_s13, %s26_s13 }
   0x4   :  { %p550_p0 = scmp.ne.s32.totalorder %s26_s13, %s549_s14  ;;  %p555_p2 = scmp.lt.s32.totalorder %s549_s14, %s549_s14 }
   0x6   :  { %p556_p3 = por %p555_p2, %p554_p1 }
   0x8   :  { %p557_p4 = pnand %p556_p3, %p550_p0 }
   0xa   :  { %560 = shalt.err (!%p557_p4)
}
   0xb   :  { %s606_s15 = smov 64   ;;  %s607_s16 = smov 4  }
   0xc   :  { %31 = dma.hbm_to_vmem [thread:$0]  %s684_s1, 2304, %s26_s13, [#allocation5], %s606_s15, %s606_s15, %s607_s16  }
   0xd   :  { %s608_s19 = smov [#allocation2]   ;;  %s609_s21 = smov [#allocation6]  }
   0xe   :  { %s16_s20 = sshll.u32 %s608_s19, 4  ;;  %s38_s22 = sshll.u32 %s609_s21, 4  ;;  %s17_s20 = int_to_ptr.vmem [resolvable:$true] %s16_s20  ;;  %s39_s22 = int_to_ptr.vmem [resolvable:$true] %s38_s22 }
   0xf   :  { %s569_s23 = scalar_lea.vmem %s17_s20, 128  ;;  %p574_p6 = scmp.lt.s32.totalorder %s17_s20, %s17_s20 }
  0x10   :  { %p570_p5 = scmp.ne.s32.totalorder %s17_s20, %s569_s23  ;;  %p575_p7 = scmp.lt.s32.totalorder %s569_s23, %s569_s23 }
  0x12   :  { %p576_p8 = por %p575_p7, %p574_p6 }
  0x14   :  { %p577_p9 = pnand %p576_p8, %p570_p5 }
  0x16   :  { %580 = shalt.err (!%p577_p9)
}
  0x17   :  { %19 = dma.hbm_to_vmem [thread:$0]  %s683_s0, 128, %s17_s20, [#allocation3]  }
  0x18   :  { %s589_s26 = scalar_lea.vmem %s39_s22, 128  ;;  %p594_p11 = scmp.lt.s32.totalorder %s39_s22, %s39_s22 }
  0x19   :  { %p590_p10 = scmp.ne.s32.totalorder %s39_s22, %s589_s26  ;;  %p595_p12 = scmp.lt.s32.totalorder %s589_s26, %s589_s26 }
  0x1b   :  { %p596_p13 = por %p595_p12, %p594_p11 }
  0x1d   :  { %p597_p0 = pnand %p596_p13, %p590_p10 }
  0x1f   :  { %600 = shalt.err (!%p597_p0)
}
  0x20   :  { %41 = dma.hbm_to_vmem [thread:$0]  %s685_s2, 128, %s39_s22, [#allocation5]  }
  0x21   :  { %601 = dma.done.wait [#allocation3], 128  }
  0x22   :  { %602 = vsyncadd [#allocation3], 4294967168 }
  0x23   :  { %603 = dma.done.wait [#allocation5], 2432  }
  0x24   :  { %604 = vsyncadd [#allocation5], 4294964864  ;;  %v610_v0 = vmov 0.0   ;;  %vm611_vm0 = vmmov 0   ;;  %v519_v1 = vld [vmem:[#allocation4 + $0x8] sm:$0xff]   ;;  %v520_v2 = vld [vmem:[#allocation4] sm:$0xff]   ;;  %v59_v13 = vlaneseq }
  0x25   :  { %464 = vmatprep.subr.bf16.mxu0 %v610_v0  ;;  %468 = vmatprep.mubr.msk.bf16.mxu0 %vm611_vm0, %v610_v0  ;;  %v52_v3 = vld [vmem:[#allocation2] sm:$0xff]  ;;  %vm75_vm1 = vcmask 261120   ;;  %v521_v5 = vld [vmem:[#allocation4 + $0x48] sm:$0xff]   ;;  %v522_v6 = vld [vmem:[#allocation4 + $0x40] sm:$0xff]   ;;  %vm416_vm2 = vcmask 64512  }
  0x26   :  { %472 = vmatprep.subr.bf16.mxu1 %v610_v0  ;;  %488 = vmatprep.mubr.msk.bf16.mxu1 %vm611_vm0, %v610_v0  ;;  %v58_v4 = vpack.c.bf16 %v52_v3, %v52_v3  ;;  %v523_v7 = vld [vmem:[#allocation4 + $0x38] sm:$0xff]   ;;  %v524_v8 = vld [vmem:[#allocation4 + $0x30] sm:$0xff]   ;;  %v525_v9 = vld [vmem:[#allocation4 + $0x28] sm:$0xff]   ;;  %v655_v14 = vshrl.u32 %v59_v13, 7 }
  0x27   :  { %465 = vmatpush3.bf16.msra.mxu0 %v519_v1  ;;  %473 = vmatpush3.bf16.msra.mxu1 %v521_v5  ;;  %v526_v10 = vld [vmem:[#allocation4 + $0x20] sm:$0xff]   ;;  %v527_v11 = vld [vmem:[#allocation4 + $0x18] sm:$0xff]   ;;  %v528_v12 = vld [vmem:[#allocation4 + $0x10] sm:$0xff]  }
  0x28   :  { %466 = vmatprep.subr.bf16.mxu0 %v610_v0  ;;  %474 = vmatprep.subr.bf16.mxu1 %v610_v0  ;;  %v61_v15 = vsub.s32 0, %v655_v14  ;;  %v658_v16 = vld [vmem:[#allocation6] sm:$0xff]  ;;  %v146_v47 = vsub.s32 1, %v655_v14  ;;  %v156_v51 = vsub.s32 2, %v655_v14  ;;  %v529_v57 = vld [vmem:[#allocation4 + $0x88] sm:$0xff]   ;;  %v530_v58 = vld [vmem:[#allocation4 + $0x80] sm:$0xff]  }
  0x29   :  { %v531_v59 = vld [vmem:[#allocation4 + $0x78] sm:$0xff]   ;;  %v532_v60 = vld [vmem:[#allocation4 + $0x70] sm:$0xff]   ;;  %v533_v61 = vld [vmem:[#allocation4 + $0x68] sm:$0xff]  }
  0x2a   :  { %v62_v17 = vrot.slane %v658_v16, %v61_v15  ;;  %v534_v62 = vld [vmem:[#allocation4 + $0x60] sm:$0xff]   ;;  %v535_v63 = vld [vmem:[#allocation4 + $0x58] sm:$0xff]   ;;  %v536_v1 = vld [vmem:[#allocation4 + $0x50] sm:$0xff]  }
  0x2b   :  { %467 = vmatpush3.bf16.msra.mxu0 %v520_v2  ;;  %475 = vmatpush3.bf16.msra.mxu1 %v522_v6  ;;  %v178_v2 = vsub.s32 3, %v655_v14 }
  0x2c   :  { %492 = vmatprep.subr.bf16.mxu0 %v610_v0  ;;  %476 = vmatprep.subr.bf16.mxu1 %v610_v0 }
  0x2d   :  { %v179_v3 = vrot.slane %v658_v16, %v178_v2 }
  0x2e   :  { %469 = vmatmul.mubr.msk.bf16.vlgmr.msra.gmra.mxu0 %vm75_vm1, %v58_v4 }
  0x2f   :  { %508 = vmatprep.mubr.msk.bf16.mxu0 %vm611_vm0, %v610_v0  ;;  %477 = vmatpush3.bf16.msra.mxu1 %v523_v7 }
  0x30   :  { %478 = vmatprep.subr.bf16.mxu1 %v610_v0  ;;  %493 = vmatpush3.bf16.msra.mxu0 %v529_v57 }
  0x31   :  { %494 = vmatprep.subr.bf16.mxu0 %v610_v0 }
  0x33   :  { %479 = vmatpush3.bf16.msra.mxu1 %v524_v8 }
  0x34   :  { %480 = vmatprep.subr.bf16.mxu1 %v610_v0  ;;  %495 = vmatpush3.bf16.msra.mxu0 %v530_v58 }
  0x35   :  { %496 = vmatprep.subr.bf16.mxu0 %v610_v0 }
  0x37   :  { %481 = vmatpush3.bf16.msra.mxu1 %v525_v9 }
  0x38   :  { %482 = vmatprep.subr.bf16.mxu1 %v610_v0  ;;  %497 = vmatpush3.bf16.msra.mxu0 %v531_v59 }
  0x39   :  { %498 = vmatprep.subr.bf16.mxu0 %v610_v0 }
  0x3b   :  { %483 = vmatpush3.bf16.msra.mxu1 %v526_v10 }
  0x3c   :  { %484 = vmatprep.subr.bf16.mxu1 %v610_v0  ;;  %499 = vmatpush3.bf16.msra.mxu0 %v532_v60 }
  0x3d   :  { %500 = vmatprep.subr.bf16.mxu0 %v610_v0 }
  0x3f   :  { %485 = vmatpush3.bf16.msra.mxu1 %v527_v11 }
  0x40   :  { %486 = vmatprep.subr.bf16.mxu1 %v610_v0  ;;  %501 = vmatpush3.bf16.msra.mxu0 %v533_v61 }
  0x41   :  { %502 = vmatprep.subr.bf16.mxu0 %v610_v0 }
  0x43   :  { %487 = vmatpush3.bf16.msra.mxu1 %v528_v12 }
  0x44   :  { %503 = vmatpush3.bf16.msra.mxu0 %v534_v62 }
  0x45   :  { %504 = vmatprep.subr.bf16.mxu0 %v610_v0 }
  0x48   :  { %505 = vmatpush3.bf16.msra.mxu0 %v535_v63 }
  0x49   :  { %506 = vmatprep.subr.bf16.mxu0 %v610_v0 }
  0x4c   :  { %507 = vmatpush3.bf16.msra.mxu0 %v536_v1 }
  0xee   :  { %v113_v18 = vpop.f32.mrf.mxu0 }
  0xef   :  { %v114_v19 = vadd.f32 %v113_v18, %v62_v17 }
  0xf0   :  { %v470_v20 = vpop.f32.mrf.mxu0 }
  0xf1   :  { %v119_v21 = vmul.f32 0.16666667, %v114_v19 }
  0xf2   :  { %v116_v22 = vpop.f32.mrf.mxu0 }
  0xf3   :  { %v120_v23 = vadd.f32 0.5, %v119_v21 }
  0xf4   :  { %v471_v24 = vpop.f32.mrf.mxu0 }
  0xf5   :  { %v121_v25 = vmax.f32 %v120_v23, 0.0 }
  0xf7   :  { %v122_v26 = vmin.f32 %v121_v25, 1.0 }
  0xf9   :  { %v123_v27 = vrot.slane %v122_v26, 4  ;;  %v131_v28 = vmul.f32 %v122_v26, %v122_v26 }
  0xfb   :  { %v124_v29 = vadd.f32 %v123_v27, %v122_v26  ;;  %v132_v30 = vrot.slane %v131_v28, 4 }
  0xfd   :  { %v125_v31 = vrot.slane %v124_v29, 2  ;;  %v133_v32 = vadd.f32 %v132_v30, %v131_v28 }
  0xff   :  { %v126_v33 = vadd.f32 %v125_v31, %v124_v29  ;;  %v134_v34 = vrot.slane %v133_v32, 2 }
 0x101   :  { %v127_v35 = vrot.slane %v126_v33, 1  ;;  %v135_v36 = vadd.f32 %v134_v34, %v133_v32  ;;  %v294_v34 = vsub.s32 4, %v655_v14 }
 0x103   :  { %v136_v37 = vrot.slane %v135_v36, 1  ;;  %v128_v38 = vadd.f32 %v127_v35, %v126_v33 }
 0x105   :  { %v137_v39 = vadd.f32 %v136_v37, %v135_v36  ;;  %v130_v40 = vmul.f32 0.125, %v128_v38  ;;  %v304_v38 = vsub.s32 5, %v655_v14 }
 0x107   :  { %v138_v41 = vmul.f32 0.125, %v137_v39  ;;  %v139_v42 = vmul.f32 %v130_v40, %v130_v40 }
 0x109   :  { %v140_v43 = vsub.f32 %v138_v41, %v139_v42 }
 0x10b   :  { %v141_v44 = vadd.f32 1e-05, %v140_v43 }
 0x10d   :  { %537 = vrsqrt.f32 %v141_v44  ;;  %v326_v44 = vsub.s32 6, %v655_v14 }
 0x11a   :  { %v538_v45 = vpop.eup %537 }
 0x11b   :  { %v143_v46 = vmul.f32 %v538_v45, %v658_v16  ;;  %v327_v45 = vrot.slane %v658_v16, %v326_v44 }
 0x11d   :  { %v149_v48 = vmul.f32 %v143_v46, %v130_v40  ;;  %v147_v49 = vrot.slane %v143_v46, %v146_v47 }
 0x11f   :  { %v151_v50 = vrot.slane %v149_v48, 7  ;;  %v148_v53 = vmul.f32 %v147_v49, %v122_v26 }
 0x121   :  { %v153_v52 = vsub.f32 %v658_v16, %v151_v50 }
 0x123   :  { %v157_v54 = vrot.slane %v153_v52, %v156_v51 }
 0x125   :  { %v158_v55 = vadd.f32 %v157_v54, %v148_v53 }
 0x127   :  { %v175_v56 = vpack.c.bf16 %v158_v55, %v158_v55 }
 0x129   :  { %489 = vmatmul.mubr.bf16.vlgmr.msra.gmra.mxu1 %v175_v56 }
 0x1e9   :  { %v262_v4 = vpop.f32.mrf.mxu1 }
 0x1ea   :  { %v263_v5 = vadd.f32 %v262_v4, %v179_v3 }
 0x1eb   :  { %v490_v6 = vpop.f32.mrf.mxu1 }
 0x1ec   :  { %v268_v7 = vmul.f32 0.16666667, %v263_v5 }
 0x1ed   :  { %v265_v8 = vpop.f32.mrf.mxu1 }
 0x1ee   :  { %v269_v9 = vadd.f32 0.5, %v268_v7 }
 0x1ef   :  { %v491_v10 = vpop.f32.mrf.mxu1 }
 0x1f0   :  { %v270_v11 = vmax.f32 %v269_v9, 0.0 }
 0x1f2   :  { %v271_v12 = vmin.f32 %v270_v11, 1.0 }
 0x1f4   :  { %v272_v13 = vrot.slane %v271_v12, 4  ;;  %v279_v15 = vmul.f32 %v271_v12, %v271_v12 }
 0x1f6   :  { %v273_v17 = vadd.f32 %v272_v13, %v271_v12  ;;  %v280_v18 = vrot.slane %v279_v15, 4 }
 0x1f8   :  { %v274_v19 = vrot.slane %v273_v17, 2  ;;  %v281_v0 = vadd.f32 %v280_v18, %v279_v15 }
 0x1fa   :  { %v275_v20 = vadd.f32 %v274_v19, %v273_v17  ;;  %v282_v21 = vrot.slane %v281_v0, 2 }
 0x1fc   :  { %v276_v22 = vrot.slane %v275_v20, 1  ;;  %v283_v23 = vadd.f32 %v282_v21, %v281_v0 }
 0x1fe   :  { %v277_v24 = vadd.f32 %v276_v22, %v275_v20  ;;  %v284_v25 = vrot.slane %v283_v23, 1 }
 0x200   :  { %v278_v26 = vmul.f32 0.125, %v277_v24  ;;  %v285_v27 = vadd.f32 %v284_v25, %v283_v23 }
 0x202   :  { %v286_v28 = vmul.f32 0.125, %v285_v27  ;;  %v287_v29 = vmul.f32 %v278_v26, %v278_v26 }
 0x204   :  { %v288_v30 = vsub.f32 %v286_v28, %v287_v29 }
 0x206   :  { %v289_v31 = vadd.f32 1e-05, %v288_v30 }
 0x208   :  { %539 = vrsqrt.f32 %v289_v31 }
 0x215   :  { %v540_v32 = vpop.eup %539 }
 0x216   :  { %v291_v33 = vmul.f32 %v540_v32, %v658_v16 }
 0x218   :  { %v297_v35 = vmul.f32 %v291_v33, %v278_v26  ;;  %v295_v36 = vrot.slane %v291_v33, %v294_v34 }
 0x21a   :  { %v299_v37 = vrot.slane %v297_v35, 7  ;;  %v296_v40 = vmul.f32 %v295_v36, %v271_v12 }
 0x21c   :  { %v301_v39 = vsub.f32 %v658_v16, %v299_v37 }
 0x21e   :  { %v305_v41 = vrot.slane %v301_v39, %v304_v38 }
 0x220   :  { %v306_v42 = vadd.f32 %v305_v41, %v296_v40 }
 0x222   :  { %v323_v43 = vpack.c.bf16 %v306_v42, %v306_v42 }
 0x224   :  { %509 = vmatmul.mubr.bf16.vlgmr.msra.gmra.mxu0 %v323_v43 }
 0x2e4   :  { %v410_v46 = vpop.f32.mrf.mxu0 }
 0x2e5   :  { %v411_v47 = vadd.f32 %v410_v46, %v327_v45 }
 0x2e6   :  { %v510_v48 = vpop.f32.mrf.mxu0 }
 0x2e7   :  { %417 = vst.msk [vmem:[%s686_s3] sm:$0xff] %vm416_vm2, %v411_v47 }
 0x2e8   :  { %v413_v49 = vpop.f32.mrf.mxu0 }
 0x2ea   :  { %v511_v50 = vpop.f32.mrf.mxu0 }
 0x2eb   :  { %422 = vsyncpa [#allocation3], 1 }
 0x2ec   :  { %423 = vsyncpa [#allocation5], 1 }

</bundles_post_ra>
